<compile_context>
chip_gen: v7x
topology: tpu7x:2x2x1
jax: 0.10.0
libtpu: 0.0.40
codegen_flags: <defaults>
</compile_context>

<pallas_src>
import functools

import jax
import jax.numpy as jnp
from jax.experimental import pallas as pl
from jax.experimental.pallas import tpu as pltpu


def _normalization_kernel(scale_ref, bias_ref, img_ref, out_ref, *, row_tile):
    # scale_ref / bias_ref : (rows_pad, 1) f32, VMEM-resident across the grid
    # img_ref / out_ref    : (row_tile, col_tile) blocks of the (N*C, H*W) view
    r0 = pl.multiple_of(pl.program_id(0) * row_tile, row_tile)
    scale = scale_ref[pl.ds(r0, row_tile), :]        # (row_tile, 1)
    bias = bias_ref[pl.ds(r0, row_tile), :]          # (row_tile, 1)
    x = img_ref[...].astype(jnp.float32)
    out_ref[...] = (x * scale + bias).astype(out_ref.dtype)   # broadcast over lanes


def _sublane_align(*dtypes):
    """Min sublane multiple for the given dtypes (8 f32 / 16 bf16 / 32 int8)."""
    align = 8
    for d in dtypes:
        isz = jnp.dtype(d).itemsize
        align = max(align, {4: 8, 2: 16, 1: 32}.get(isz, 8))
    return align


def _ceil_div(a, b):
    return -(-a // b)


def _round_up(a, m):
    return _ceil_div(a, m) * m


def _choose_tiles(rows, cols, in_dtype, out_dtype,
                  target_block_bytes=4 * 1024 * 1024, min_steps=4):
    """Pick (row_tile, col_tile) for the lane-dense (rows, cols) view.

    target_block_bytes budgets the *input* image block; the wrapper sizes
    vmem_limit_bytes to cover the double-buffered input + output blocks.
    """
    align = _sublane_align(in_dtype, out_dtype)
    in_bpe = jnp.dtype(in_dtype).itemsize
    row_bytes = max(1, cols * in_bpe)
    total_bytes = rows * row_bytes

    rows_in_budget = target_block_bytes // row_bytes

    if rows_in_budget >= min(rows, align):
        # Full-width rows; tile along the row (sublane) dimension only.
        col_tile = cols
        if rows_in_budget >= rows:
            row_tile = rows
        else:
            row_tile = max(align, (rows_in_budget // align) * align)
        # Keep >= min_steps grid steps so DMA-in/compute/DMA-out overlap,
        # unless the whole problem is tiny (then one block is cheapest).
        if _ceil_div(rows, row_tile) < min_steps and total_bytes > (2 << 20):
            if rows >= min_steps * align:
                row_tile = _round_up(_ceil_div(rows, min_steps), align)
            elif cols > 128:
                # Too few rows to split further -> split the lane dim instead.
                col_tile = min(cols,
                               max(128, _round_up(_ceil_div(cols, min_steps), 128)))
    else:
        # Even `align` full-width rows bust the budget: tile the lane dim too
        # (avoids a single tens-of-MiB block -> VMEM OOM on v7x's 64 MiB).
        row_tile = min(rows, align)
        col_budget = max(128, target_block_bytes // max(1, row_tile * in_bpe))
        col_tile = min(cols, (col_budget // 128) * 128)
    return row_tile, col_tile


def normalization(img, mean, std):
    """(img - mean[:, None, None]) / std[:, None, None] for NCHW `img`."""
    N, C, H, W = img.shape
    rows = N * C
    cols = H * W

    # Match PyTorch type promotion: f32 stats promote int / low-precision imgs.
    out_dtype = jnp.promote_types(img.dtype, jnp.float32)

    # FMA form in f32: (x - mean) / std == x * (1/std) + (-mean/std).
    mean_f32 = jnp.asarray(mean, dtype=jnp.float32).reshape(-1)
    std_f32 = jnp.asarray(std, dtype=jnp.float32).reshape(-1)
    scale = 1.0 / std_f32                        # (C,)
    bias = -mean_f32 * scale                     # (C,)

    row_tile, col_tile = _choose_tiles(rows, cols, img.dtype, out_dtype)
    grid = (_ceil_div(rows, row_tile), _ceil_div(cols, col_tile))
    rows_pad = grid[0] * row_tile                # keeps in-kernel slices in-bounds

    # Row r of the (N*C, H*W) view uses channel r % C.
    scale_rows = jnp.tile(scale, N)
    bias_rows = jnp.tile(bias, N)
    if rows_pad > rows:
        pad = rows_pad - rows
        scale_rows = jnp.concatenate([scale_rows, jnp.ones((pad,), jnp.float32)])
        bias_rows = jnp.concatenate([bias_rows, jnp.zeros((pad,), jnp.float32)])
    scale_rows = scale_rows.reshape(rows_pad, 1)
    bias_rows = bias_rows.reshape(rows_pad, 1)

    img2d = img.reshape(rows, cols)

    in_bpe = jnp.dtype(img.dtype).itemsize
    out_bpe = jnp.dtype(out_dtype).itemsize
    block_bytes = row_tile * col_tile * (in_bpe + out_bpe)
    resident_bytes = 2 * rows_pad * 128 * 4      # scale/bias lane-padded to 128
    vmem_limit = int(min(max(2 * block_bytes + resident_bytes + (4 << 20),
                             32 << 20),
                         48 << 20))              # stays under v7x's 64 MiB VMEM

    kernel = functools.partial(_normalization_kernel, row_tile=row_tile)

    out2d = pl.pallas_call(
        kernel,
        out_shape=jax.ShapeDtypeStruct((rows, cols), out_dtype),
        grid_spec=pl.GridSpec(
            grid=grid,
            in_specs=[
                # scale/bias: same block index every step -> DMA'd once, resident.
                pl.BlockSpec((rows_pad, 1), lambda i, j: (0, 0)),
                pl.BlockSpec((rows_pad, 1), lambda i, j: (0, 0)),
                pl.BlockSpec((row_tile, col_tile), lambda i, j: (i, j)),
            ],
            out_specs=pl.BlockSpec((row_tile, col_tile), lambda i, j: (i, j)),
        ),
        compiler_params=pltpu.CompilerParams(
            # Both axes are independent; parallel lets megacore chips (v7x: 2
            # TensorCores) shard the grid across cores.
            dimension_semantics=(pltpu.PARALLEL, pltpu.PARALLEL),
            vmem_limit_bytes=vmem_limit,
        ),
    )(scale_rows, bias_rows, img2d)

    return out2d.reshape(N, C, H, W)


if __name__ == "__main__":
    key = jax.random.PRNGKey(0)

    def reference(img, mean, std):
        return (img.astype(jnp.float32) - mean[:, None, None]) / std[:, None, None]

    # 1) Spec-consistent small case: batch=2, channels=4, spatial=16x16.
    k1, k2, k3 = jax.random.split(key, 3)
    N, C, H, W = 2, 4, 16, 16
    img = jax.random.uniform(k1, (N, C, H, W), dtype=jnp.float32)
    mean = jnp.array([0.485, 0.456, 0.406, 0.5], dtype=jnp.float32)
    std = jnp.array([0.229, 0.224, 0.225, 0.25], dtype=jnp.float32)
    out = jax.block_until_ready(normalization(img, mean, std))
    assert out.shape == img.shape and out.dtype == jnp.float32
    assert jnp.allclose(out, reference(img, mean, std), atol=1e-5, rtol=1e-5), \
        "mismatch vs reference (small case)"

    # 2) Exercise the row-tiled path (multiple row blocks, dynamic scale slice).
    N, C, H, W = 64, 8, 64, 64
    img = jax.random.uniform(k2, (N, C, H, W), dtype=jnp.float32)
    mean = jnp.linspace(0.1, 0.9, C).astype(jnp.float32)
    std = jnp.linspace(0.2, 0.5, C).astype(jnp.float32)
    out = jax.block_until_ready(normalization(img, mean, std))
    assert jnp.allclose(out, reference(img, mean, std), atol=1e-5, rtol=1e-5), \
        "mismatch vs reference (row-tiled case)"

    # 3) Exercise the column-tiled path (large H*W per row).
    N, C, H, W = 1, 3, 512, 512
    img = jax.random.uniform(k3, (N, C, H, W), dtype=jnp.float32)
    mean = jnp.array([0.485, 0.456, 0.406], dtype=jnp.float32)
    std = jnp.array([0.229, 0.224, 0.225], dtype=jnp.float32)
    out = jax.block_until_ready(normalization(img, mean, std))
    assert jnp.allclose(out, reference(img, mean, std), atol=1e-5, rtol=1e-5), \
        "mismatch vs reference (column-tiled case)"

    print("KERNEL_OK")
</pallas_src>

<mosaic_0001>
module attributes {stable_mosaic.version = 11 : i64} {
  func.func @_normalization_kernel(%arg0: i32, %arg1: i32, %arg2: memref<8x1xf32, #tpu.memory_space<vmem>>, %arg3: memref<8x1xf32, #tpu.memory_space<vmem>>, %arg4: memref<8x256xf32, #tpu.memory_space<vmem>>, %arg5: memref<8x256xf32, #tpu.memory_space<vmem>>) attributes {dimension_semantics = [#tpu.dimension_semantics<parallel>, #tpu.dimension_semantics<parallel>], iteration_bounds = array<i64: 1, 1>, scalar_prefetch = 0 : i64, scratch_operands = 0 : i64, tpu.core_type = #tpu.core_type<tc>, window_params = [{pipeline_mode = #tpu.pipeline_mode<synchronous>, transform_indices = @transform_0, window_bounds = array<i64: 8, 1>}, {pipeline_mode = #tpu.pipeline_mode<synchronous>, transform_indices = @transform_1, window_bounds = array<i64: 8, 1>}, {transform_indices = @transform_2, window_bounds = array<i64: 8, 256>}, {transform_indices = @transform_3, window_bounds = array<i64: 8, 256>}]} {
    %c8_i32 = arith.constant 8 : i32
    %0 = arith.muli %arg0, %c8_i32 : i32
    %1 = tpu.assume_multiple %0, 8 : i32
    %2 = arith.index_cast %1 : i32 to index
    %c0 = arith.constant 0 : index
    %3 = vector.load %arg2[%2, %c0] : memref<8x1xf32, #tpu.memory_space<vmem>>, vector<8x1xf32>
    %4 = arith.index_cast %1 : i32 to index
    %c0_0 = arith.constant 0 : index
    %5 = vector.load %arg3[%4, %c0_0] : memref<8x1xf32, #tpu.memory_space<vmem>>, vector<8x1xf32>
    %c0_1 = arith.constant 0 : index
    %c0_2 = arith.constant 0 : index
    %6 = vector.load %arg4[%c0_1, %c0_2] : memref<8x256xf32, #tpu.memory_space<vmem>>, vector<8x256xf32>
    %7 = vector.broadcast %3 : vector<8x1xf32> to vector<8x256xf32>
    %8 = arith.mulf %6, %7 : vector<8x256xf32>
    %9 = vector.broadcast %5 : vector<8x1xf32> to vector<8x256xf32>
    %10 = arith.addf %8, %9 : vector<8x256xf32>
    %c0_3 = arith.constant 0 : index
    %c0_4 = arith.constant 0 : index
    %11 = vector.load %arg5[%c0_3, %c0_4] : memref<8x256xf32, #tpu.memory_space<vmem>>, vector<8x256xf32>
    tpu.vector_store %arg5[%c0_3, %c0_4], %10 {strides = array<i32>} : memref<8x256xf32, #tpu.memory_space<vmem>>, vector<8x256xf32>,
    return
  }
  func.func @transform_0(%arg0: i32, %arg1: i32) -> (i32, i32) {
    %c0_i32 = arith.constant 0 : i32
    %c0_i32_0 = arith.constant 0 : i32
    %c0_i32_1 = arith.constant 0 : i32
    return %c0_i32, %c0_i32_0 : i32, i32
  }
  func.func @transform_1(%arg0: i32, %arg1: i32) -> (i32, i32) {
    %c0_i32 = arith.constant 0 : i32
    %c0_i32_0 = arith.constant 0 : i32
    %c0_i32_1 = arith.constant 0 : i32
    return %c0_i32, %c0_i32_0 : i32, i32
  }
  func.func @transform_2(%arg0: i32, %arg1: i32) -> (i32, i32) {
    %c0_i32 = arith.constant 0 : i32
    return %arg0, %arg1 : i32, i32
  }
  func.func @transform_3(%arg0: i32, %arg1: i32) -> (i32, i32) {
    %c0_i32 = arith.constant 0 : i32
    return %arg0, %arg1 : i32, i32
  }
}

</mosaic_0001>

<bundles_post_ra>
// kernel: tpu_custom_call.1
= control target key start
LH: loop header
LB: loop body
LE: loop exit
PB: predicated region body
PF: predicated region fallthrough
CT: control target
= control target key end

     0   :  { %v79_v1 = vmov 0   ;;  %s125_s0 = inlined_call_operand.vmem [shape: f32[8,1], index: 0, kind: input, shape index: {}]   ;;  %s126_s1 = inlined_call_operand.vmem [shape: f32[8,1], index: 1, kind: input, shape index: {}]   ;;  %s127_s2 = inlined_call_operand.vmem [shape: f32[8,256], index: 2, kind: input, shape index: {}]   ;;  %s128_s3 = inlined_call_operand.hbm [shape: f32[8,256], index: 3, kind: output, shape index: {}]  }
   0x1   :  { %v17_v0 = vld [vmem:[%s125_s0] sm:$0xff]  ;;  %54 = vset.pattern.permute.xlu0 %v79_v1 }
   0x2   :  { %8 = vsyncpa [#allocation3], 0  ;;  %24 = vperm.xlu0 %54, %v17_v0   ;;  %v19_v2 = vld [vmem:[%s126_s1] sm:$0xff]  ;;  %v21_v4 = vld [vmem:[%s127_s2 + $0x8] sm:$0xff]  ;;  %s80_s20 = smov [#allocation2]  }
   0x3   :  { %v20_v3 = vld [vmem:[%s127_s2] sm:$0xff]  ;;  %s44_s0 = sshll.u32 %s80_s20, 4  ;;  %s45_s0 = int_to_ptr.vmem [resolvable:$true] %s44_s0 }
   0x4   :  { %s55_s1 = scalar_lea.vmem %s45_s0, 256  ;;  %p60_p1 = scmp.lt.s32.totalorder %s45_s0, %s45_s0 }
   0x5   :  { %p56_p0 = scmp.ne.s32.totalorder %s45_s0, %s55_s1  ;;  %p61_p2 = scmp.lt.s32.totalorder %s55_s1, %s55_s1 }
   0x6   :  { %31 = vperm.xlu0 %54, %v19_v2  }
   0x7   :  { %p62_p3 = por %p61_p2, %p60_p1 }
   0x9   :  { %p63_p4 = pnand %p62_p3, %p56_p0 }
  0x81   :  { %v25_v5 = vpop.permute.xlu0 %24 }
  0x82   :  { %v27_v6 = vmul.f32 %v25_v5, %v20_v3  ;;  %v28_v7 = vmul.f32 %v25_v5, %v21_v4 }
  0x85   :  { %v32_v8 = vpop.permute.xlu0 %31 }
  0x86   :  { %v34_v9 = vadd.f32 %v32_v8, %v27_v6  ;;  %v35_v10 = vadd.f32 %v32_v8, %v28_v7 }
  0x88   :  { %36 = vst [vmem:[#allocation2] sm:$0xff] %v34_v9  ;;  %37 = vst [vmem:[#allocation2 + $0x8] sm:$0xff] %v35_v10 }
  0x89   :  { %66 = shalt.err (!%p63_p4)
}
  0x8a   :  { %s67_s22 = scalar_lea.hbm %s128_s3, 256 }
  0x8b   :  { %p68_p5 = scmp.ne.s32.totalorder %s128_s3, %s67_s22  ;;  %p71_p6 = scmp.lt.u32.totalorder %s67_s22, %s128_s3 }
  0x8d   :  { %p73_p7 = pnand %p71_p6, %p68_p5 }
  0x8f   :  { %76 = shalt.err (!%p73_p7)
}
  0x90   :  { %47 = dma.vmem_to_hbm [thread:$0]  %s45_s0, 256, %s128_s3, [#allocation3]  }
  0x91   :  { %77 = dma.done.wait [#allocation3], 256  }
  0x92   :  { %78 = vsyncadd [#allocation3], 4294967040 }
  0x93   :  { %51 = vsyncpa [#allocation3], 1 }

</bundles_post_ra>
